<compile_context>
chip_gen: v5e
topology: v5e:2x2
jax: 0.10.0
libtpu: 0.0.40
codegen_flags: <defaults>
</compile_context>

<pallas_src>
import math
import functools

import numpy as np
import jax
import jax.numpy as jnp
from jax import lax
from jax.experimental import pallas as pl
from jax.experimental.pallas import tpu as pltpu


_MASK_VALUE = -1e30  # large finite negative: avoids (-inf) - (-inf) = NaN


def _pick_tile(n, candidates):
    """Largest candidate that divides n; fall back to the full extent."""
    for c in candidates:
        if c <= n and n % c == 0:
            return c
    return n


# --------------------------------------------------------------------------
# Tiled projection matmul:  (M, K) @ (K, N) -> (M, N)
# --------------------------------------------------------------------------
def _matmul_kernel(x_ref, w_ref, o_ref, *, compute_dtype):
    x = x_ref[...].astype(compute_dtype)
    w = w_ref[...].astype(compute_dtype)
    o_ref[...] = jnp.dot(x, w, preferred_element_type=jnp.float32).astype(o_ref.dtype)


def _matmul(x, w, *, out_dtype, compute_dtype):
    M, K = x.shape
    Kw, N = w.shape
    assert K == Kw
    tm = _pick_tile(M, (256, 128, 64, 32, 16, 8))
    tn = _pick_tile(N, (512, 256, 128))  # lane-dense output tile; else full N
    kernel = functools.partial(_matmul_kernel, compute_dtype=compute_dtype)
    return pl.pallas_call(
        kernel,
        out_shape=jax.ShapeDtypeStruct((M, N), out_dtype),
        grid_spec=pltpu.PrefetchScalarGridSpec(
            num_scalar_prefetch=0,
            grid=(M // tm, N // tn),
            in_specs=[
                pl.BlockSpec((tm, K), lambda i, j: (i, 0)),
                pl.BlockSpec((K, tn), lambda i, j: (0, j)),
            ],
            out_specs=pl.BlockSpec((tm, tn), lambda i, j: (i, j)),
        ),
        compiler_params=pltpu.CompilerParams(
            dimension_semantics=("parallel", "parallel")),
    )(x, w)


# --------------------------------------------------------------------------
# Fused flash attention + output projection
#   q, k, v : (B, H, T, hd);  w_proj : (C, C);  out : (B, T, C)
#   grid = (B, T//tq, T//tkv)
# --------------------------------------------------------------------------
def _flash_proj_kernel(q_ref, k_ref, v_ref, wp_ref, o_ref,
                       m_sc, l_sc, acc_sc, y_sc, *,
                       scale, compute_dtype, approx_recip):
    qi = pl.program_id(1)
    ki = pl.program_id(2)
    n_head, tq, hd = acc_sc.shape
    tkv = k_ref.shape[2]

    @pl.when(ki == 0)
    def _init():
        m_sc[...] = jnp.full_like(m_sc[...], _MASK_VALUE)
        l_sc[...] = jnp.zeros_like(l_sc[...])
        acc_sc[...] = jnp.zeros_like(acc_sc[...])

    q_start = qi * tq
    kv_start = ki * tkv

    # Skip KV tiles entirely above the causal diagonal for this q tile.
    @pl.when(kv_start <= q_start + (tq - 1))
    def _update():
        # Fold 1/sqrt(hd) into q once, then cast MXU operands to compute dtype.
        q = (q_ref[0].astype(jnp.float32) * scale).astype(compute_dtype)  # (H, tq, hd)
        k = k_ref[0].astype(compute_dtype)                                # (H, tkv, hd)
        v = v_ref[0].astype(compute_dtype)                                # (H, tkv, hd)

        # All heads in one batched MXU call; accumulate in f32.
        s = jnp.einsum("hqd,hkd->hqk", q, k,
                       preferred_element_type=jnp.float32)                # (H, tq, tkv)

        # Per-tile causal mask from offset iotas (no (T, T) temporary).
        row = q_start + lax.broadcasted_iota(jnp.int32, (tq, tkv), 0)
        col = kv_start + lax.broadcasted_iota(jnp.int32, (tq, tkv), 1)
        s = jnp.where((row >= col)[None, :, :], s, _MASK_VALUE)

        # Online softmax update (statistics in f32).
        m_prev = m_sc[...]                                                # (H, tq, 1)
        m_new = jnp.maximum(m_prev, s.max(axis=-1, keepdims=True))
        alpha = jnp.exp(m_prev - m_new)
        p = jnp.exp(s - m_new)

        l_sc[...] = alpha * l_sc[...] + p.sum(axis=-1, keepdims=True)
        acc_sc[...] = alpha * acc_sc[...] + jnp.einsum(
            "hqk,hkd->hqd", p.astype(compute_dtype), v,
            preferred_element_type=jnp.float32)
        m_sc[...] = m_new

    @pl.when(ki == pl.num_programs(2) - 1)
    def _finalize():
        inv_l = pl.reciprocal(l_sc[...], approx=approx_recip)             # (H, tq, 1)
        y = acc_sc[...] * inv_l                                           # (H, tq, hd)
        # Head-merge into a lane-dense (tq, C) tile (static unroll, once per q tile).
        for h in range(n_head):
            y_sc[:, h * hd:(h + 1) * hd] = y[h]
        # Fused output projection: (tq, C) @ (C, C) on the MXU, f32 accumulation.
        yc = y_sc[...].astype(compute_dtype)
        wp = wp_ref[...].astype(compute_dtype)
        o_ref[0] = jnp.dot(yc, wp,
                           preferred_element_type=jnp.float32).astype(o_ref.dtype)


# --------------------------------------------------------------------------
# Full module forward
# --------------------------------------------------------------------------
def causal_self_attention(x, w_qkv_t, w_proj_t, *, n_head,
                          compute_dtype=jnp.bfloat16,
                          block_q=256, block_kv=256):
    """x: (B, T, C) f32; w_qkv_t: (C, 3C); w_proj_t: (C, C). Returns (B, T, C)."""
    B, T, C = x.shape
    assert C % n_head == 0
    hd = C // n_head
    scale = 1.0 / math.sqrt(hd)

    # Cast weights once in the wrapper (halves weight DMA on the bf16 path;
    # identity on the f32 path).
    w_qkv_c = w_qkv_t.astype(compute_dtype)
    w_proj_c = w_proj_t.astype(compute_dtype)

    # ---- 1. QKV projection; intermediate kept in compute dtype -------------
    qkv = _matmul(x.reshape(B * T, C), w_qkv_c,
                  out_dtype=compute_dtype, compute_dtype=compute_dtype)
    qkv = qkv.reshape(B, T, 3 * C)
    q, k, v = jnp.split(qkv, 3, axis=-1)

    def to_heads(z):  # (B, T, C) -> (B, H, T, hd); wrapper-side layout plumbing
        return z.reshape(B, T, n_head, hd).transpose(0, 2, 1, 3)

    q, k, v = to_heads(q), to_heads(k), to_heads(v)

    # ---- 2. fused flash attention + output projection ----------------------
    tq = _pick_tile(T, (block_q, 128, 64, 32, 16, 8))
    tkv = _pick_tile(T, (block_kv, 128, 64, 32, 16, 8))
    approx_recip = bool(np.dtype(compute_dtype) != np.dtype(np.float32))

    kernel = functools.partial(_flash_proj_kernel, scale=scale,
                               compute_dtype=compute_dtype,
                               approx_recip=approx_recip)
    out = pl.pallas_call(
        kernel,
        out_shape=jax.ShapeDtypeStruct((B, T, C), x.dtype),
        grid_spec=pltpu.PrefetchScalarGridSpec(
            num_scalar_prefetch=0,
            grid=(B, T // tq, T // tkv),
            in_specs=[
                pl.BlockSpec((1, n_head, tq, hd), lambda b, qi, ki: (b, 0, qi, 0)),
                pl.BlockSpec((1, n_head, tkv, hd), lambda b, qi, ki: (b, 0, ki, 0)),
                pl.BlockSpec((1, n_head, tkv, hd), lambda b, qi, ki: (b, 0, ki, 0)),
                # grid-invariant projection weight: DMA'd into VMEM once
                pl.BlockSpec((C, C), lambda b, qi, ki: (0, 0)),
            ],
            out_specs=pl.BlockSpec((1, tq, C), lambda b, qi, ki: (b, qi, 0)),
            scratch_shapes=[
                pltpu.VMEM((n_head, tq, 1), jnp.float32),   # running max
                pltpu.VMEM((n_head, tq, 1), jnp.float32),   # running denom
                pltpu.VMEM((n_head, tq, hd), jnp.float32),  # per-head accumulator
                pltpu.VMEM((tq, C), jnp.float32),           # lane-dense head-merge tile
            ],
        ),
        compiler_params=pltpu.CompilerParams(
            dimension_semantics=("parallel", "parallel", "arbitrary")),
    )(q, k, v, w_proj_c)
    return out


# --------------------------------------------------------------------------
# Pure-JAX reference mirroring the PyTorch forward
# --------------------------------------------------------------------------
def _reference(x, w_qkv_t, w_proj_t, n_head):
    B, T, C = x.shape
    hd = C // n_head
    qkv = x @ w_qkv_t
    q, k, v = jnp.split(qkv, 3, axis=2)
    q = q.reshape(B, T, n_head, hd).transpose(0, 2, 1, 3)
    k = k.reshape(B, T, n_head, hd).transpose(0, 2, 1, 3)
    v = v.reshape(B, T, n_head, hd).transpose(0, 2, 1, 3)
    att = (q @ jnp.swapaxes(k, -2, -1)) * (1.0 / math.sqrt(hd))
    mask = jnp.tril(jnp.ones((T, T), dtype=bool))
    att = jnp.where(mask[None, None], att, float("-inf"))
    att = jax.nn.softmax(att, axis=-1)
    y = att @ v
    y = y.transpose(0, 2, 1, 3).reshape(B, T, C)
    return y @ w_proj_t


if __name__ == "__main__":
    # Small config consistent with the module: n_embd=32, n_head=4, T=8.
    B, T, C, n_head = 2, 8, 32, 4

    key = jax.random.PRNGKey(0)
    kx, kqkv, kproj = jax.random.split(key, 3)

    x = jax.random.normal(kx, (B, T, C), dtype=jnp.float32)
    # nn.Linear weights are (out, in); store transposed so the kernel does x @ W.
    w_qkv = jax.random.normal(kqkv, (3 * C, C), dtype=jnp.float32) * (1.0 / math.sqrt(C))
    w_proj = jax.random.normal(kproj, (C, C), dtype=jnp.float32) * (1.0 / math.sqrt(C))
    w_qkv_t = w_qkv.T      # (C, 3C)
    w_proj_t = w_proj.T    # (C, C)

    ref = _reference(x, w_qkv_t, w_proj_t, n_head)

    # Full-precision path: tight check against the reference.
    out_f32 = causal_self_attention(x, w_qkv_t, w_proj_t, n_head=n_head,
                                    compute_dtype=jnp.float32)
    out_f32 = jax.block_until_ready(out_f32)
    assert out_f32.shape == (B, T, C)
    assert jnp.allclose(out_f32, ref, atol=1e-3, rtol=1e-3), "f32 mismatch vs reference"

    # Production path: bf16 MXU operands, f32 accumulation / softmax stats.
    out_bf16 = causal_self_attention(x, w_qkv_t, w_proj_t, n_head=n_head,
                                     compute_dtype=jnp.bfloat16)
    out_bf16 = jax.block_until_ready(out_bf16)
    rel_err = jnp.max(jnp.abs(out_bf16 - ref)) / (jnp.max(jnp.abs(ref)) + 1e-6)
    assert rel_err < 5e-2, f"bf16 path too far from reference (rel_err={rel_err})"

    print("KERNEL_OK")
</pallas_src>

<mosaic_0001>
module attributes {stable_mosaic.version = 11 : i64} {
  func.func @_matmul_kernel(%arg0: i32, %arg1: i32, %arg2: memref<16x32xf32, #tpu.memory_space<vmem>>, %arg3: memref<32x96xf32, #tpu.memory_space<vmem>>, %arg4: memref<16x96xf32, #tpu.memory_space<vmem>>) attributes {dimension_semantics = [#tpu.dimension_semantics<parallel>, #tpu.dimension_semantics<parallel>], iteration_bounds = array<i64: 1, 1>, scalar_prefetch = 0 : i64, scratch_operands = 0 : i64, tpu.core_type = #tpu.core_type<tc>, window_params = [{transform_indices = @transform_0, window_bounds = array<i64: 16, 32>}, {transform_indices = @transform_1, window_bounds = array<i64: 32, 96>}, {transform_indices = @transform_2, window_bounds = array<i64: 16, 96>}]} {
    %c0 = arith.constant 0 : index
    %c0_0 = arith.constant 0 : index
    %0 = vector.load %arg2[%c0, %c0_0] : memref<16x32xf32, #tpu.memory_space<vmem>>, vector<16x32xf32>
    %c0_1 = arith.constant 0 : index
    %c0_2 = arith.constant 0 : index
    %1 = vector.load %arg3[%c0_1, %c0_2] : memref<32x96xf32, #tpu.memory_space<vmem>>, vector<32x96xf32>
    %cst = arith.constant dense<0.000000e+00> : vector<16x96xf32>
    %2 = tpu.matmul %0, %1, %cst {dimension_numbers = #tpu.dot_dimension_numbers<[1], [0], [0], [1], [0, 0, 1, 1], [], []>} : vector<16x32xf32>, vector<32x96xf32>, vector<16x96xf32> -> vector<16x96xf32>
    %c0_3 = arith.constant 0 : index
    %c0_4 = arith.constant 0 : index
    %3 = vector.load %arg4[%c0_3, %c0_4] : memref<16x96xf32, #tpu.memory_space<vmem>>, vector<16x96xf32>
    tpu.vector_store %arg4[%c0_3, %c0_4], %2 {strides = array<i32>} : memref<16x96xf32, #tpu.memory_space<vmem>>, vector<16x96xf32>,
    return
  }
  func.func @transform_0(%arg0: i32, %arg1: i32) -> (i32, i32) {
    %c0_i32 = arith.constant 0 : i32
    %c0_i32_0 = arith.constant 0 : i32
    return %arg0, %c0_i32 : i32, i32
  }
  func.func @transform_1(%arg0: i32, %arg1: i32) -> (i32, i32) {
    %c0_i32 = arith.constant 0 : i32
    %c0_i32_0 = arith.constant 0 : i32
    return %c0_i32, %arg1 : i32, i32
  }
  func.func @transform_2(%arg0: i32, %arg1: i32) -> (i32, i32) {
    %c0_i32 = arith.constant 0 : i32
    return %arg0, %arg1 : i32, i32
  }
}

</mosaic_0001>

<bundles_post_ra>
// kernel: tpu_custom_call.1
= control target key start
LH: loop header
LB: loop body
LE: loop exit
PB: predicated region body
PF: predicated region fallthrough
CT: control target
= control target key end

     0   :  { %7 = vsyncpa [#allocation3], 0  ;;  %s230_s0 = inlined_call_operand.hbm [shape: f32[16,32], index: 0, kind: input, shape index: {}]   ;;  %s231_s1 = inlined_call_operand.hbm [shape: f32[32,96], index: 1, kind: input, shape index: {}]   ;;  %s232_s2 = inlined_call_operand.hbm [shape: f32[16,96], index: 2, kind: output, shape index: {}]  }
   0x1   :  { %8 = vsyncpa [#allocation6], 0 }
   0x2   :  { %9 = vsyncpa [#allocation4], 0  ;;  %s14_s11 = sshll.u32 %s230_s0, 4  ;;  %s192_s12 = smov [#allocation2]   ;;  %s15_s11 = int_to_ptr.hbm [resolvable:$true] %s14_s11 }
   0x3   :  { %s16_s13 = sshll.u32 %s192_s12, 4  ;;  %s27_s16 = sshll.u32 %s231_s1, 4  ;;  %s17_s13 = int_to_ptr.vmem [resolvable:$true] %s16_s13  ;;  %s28_s16 = int_to_ptr.hbm [resolvable:$true] %s27_s16 }
   0x4   :  { %s193_s17 = smov 128   ;;  %s194_s18 = smov 8  }
   0x5   :  { %22 = dma.hbm_to_vmem [thread:$0]  %s15_s11, 256, %s17_s13, [#allocation3], %s193_s17, %s193_s17, %s194_s18  }
   0x6   :  { %s195_s19 = smov [#allocation5]  }
   0x7   :  { %s29_s20 = sshll.u32 %s195_s19, 4  ;;  %s30_s20 = int_to_ptr.vmem [resolvable:$true] %s29_s20 }
   0x8   :  { %35 = dma.hbm_to_vmem [thread:$0]  %s28_s16, 512, %s30_s20, [#allocation6], %s193_s17, %s193_s17, %s194_s18  }
   0x9   :  { %186 = dma.done.wait [#allocation3], 256  }
   0xa   :  { %187 = vsyncadd [#allocation3], 4294967040 }
   0xb   :  { %188 = dma.done.wait [#allocation6], 512  }
   0xc   :  { %189 = vsyncadd [#allocation6], 4294966784  ;;  %v49_v0 = vld [vmem:[#allocation5 + $0x18] sm:$0xff]  ;;  %v48_v1 = vld [vmem:[#allocation5 + $0x10] sm:$0xff]  ;;  %vm50_vm0 = vcmask 261120   ;;  %s196_s0 = smov [#allocation7]  }
   0xd   :  { %69 = vmatpush.msra.mxu0 %v49_v0  ;;  %105 = vmatpush.msra.mxu1 %v49_v0  ;;  %v47_v2 = vld [vmem:[#allocation5 + $0x8] sm:$0xff]  ;;  %v46_v3 = vld [vmem:[#allocation5] sm:$0xff]  ;;  %v44_v4 = vld [vmem:[#allocation2] sm:$0xff]  ;;  %s87_s1 = sshll.u32 %s196_s0, 4  ;;  %s89_s23 = sshll.u32 %s232_s2, 4  ;;  %vm80_vm1 = vcmask 785408   ;;  %s88_s1 = int_to_ptr.vmem [resolvable:$true] %s87_s1  ;;  %s90_s23 = int_to_ptr.hbm [resolvable:$true] %s89_s23 }
   0xe   :  { %v45_v5 = vld [vmem:[#allocation2 + $0x8] sm:$0xff] }
   0xf   :  { %70 = vmatpush.msra.mxu0 %v48_v1  ;;  %106 = vmatpush.msra.mxu1 %v48_v1 }
  0x11   :  { %71 = vmatpush.msra.mxu0 %v47_v2  ;;  %107 = vmatpush.msra.mxu1 %v47_v2 }
  0x13   :  { %72 = vmatpush.msra.mxu0 %v46_v3  ;;  %108 = vmatpush.msra.mxu1 %v46_v3 }
  0x14   :  { %103 = vmatmul.msk.f32.vlgmr.msra.gmra.mxu0 %vm50_vm0, %v44_v4  ;;  %104 = vmatmul.msk.f32.vlgmr.msra.gmra.mxu1 %vm50_vm0, %v45_v5 }
  0x91   :  { %v74_v6 = vpop.f32.mrf.mxu0  ;;  %v77_v7 = vpop.f32.mrf.mxu1 }
  0x92   :  { %81 = vst.msk [vmem:[#allocation7] sm:$0xff] %vm80_vm1, %v74_v6 }
  0x93   :  { %82 = vst.msk [vmem:[#allocation7 + $0x8] sm:$0xff] %vm80_vm1, %v77_v7 }
  0x94   :  { %95 = dma.vmem_to_hbm [thread:$0]  %s88_s1, 256, %s90_s23, [#allocation4], %s193_s17, %s193_s17, %s194_s18  }
  0x95   :  { %190 = dma.done.wait [#allocation4], 256  }
  0x96   :  { %191 = vsyncadd [#allocation4], 4294967040 }
  0x97   :  { %100 = vsyncpa [#allocation3], 1 }
  0x98   :  { %101 = vsyncpa [#allocation6], 1 }
  0x99   :  { %102 = vsyncpa [#allocation4], 1 }

</bundles_post_ra>
